<compile_context>
chip_gen: v7x
topology: tpu7x:2x2x1
jax: 0.10.0
libtpu: 0.0.40
codegen_flags: <defaults>
</compile_context>

<pallas_src>
import jax
import jax.numpy as jnp
from jax.experimental import pallas as pl
from jax.experimental.pallas import tpu as pltpu


def _linear_kernel(x_ref, wt_ref, b_ref, o_ref):
    x = x_ref[...].astype(jnp.float32)    # [TB, IN]
    wt = wt_ref[...].astype(jnp.float32)  # [IN, OUT]  (pre-transposed in wrapper)
    b = b_ref[...].astype(jnp.float32)    # [1, OUT]

    TB, IN = x_ref.shape
    OUT = o_ref.shape[-1]

    if IN <= 8:
        # K is tiny: MXU result-FIFO latency/drain dominates a 4-wide
        # contraction, so do it as IN unrolled FMAs on the VPU.
        # Bias is folded into the accumulator init (saves one vadd pass).
        acc = jnp.broadcast_to(b, (TB, OUT))
        for k in range(IN):  # unrolled at trace time (IN = 4)
            acc = acc + x[:, k:k + 1] * wt[k:k + 1, :]
        o_ref[...] = acc.astype(o_ref.dtype)
    else:
        # Real-sized layers: single MXU matmul, no in-kernel transpose.
        acc = jnp.dot(x, wt, preferred_element_type=jnp.float32)
        o_ref[...] = (acc + b).astype(o_ref.dtype)


def linear_pallas(x, w, b, *, tb_max=512):
    """y = x @ w.T + b  (PyTorch nn.Linear semantics).

    x: [B, IN], w: [OUT, IN], b: [OUT]  ->  [B, OUT]
    """
    B, IN = x.shape
    OUT, IN2 = w.shape
    assert IN == IN2, "weight shape mismatch"

    # Pre-transpose W outside the kernel (layout plumbing belongs in XLA).
    w_t = jnp.transpose(w)        # [IN, OUT]
    b2d = b.reshape(1, OUT)       # [1, OUT]

    # Batch tile: multiple of 8 (f32 sublane), capped so a double-buffered
    # x/y tile stays far under v7x's 64 MiB VMEM.
    if B >= 8:
        TB = max(8, (min(B, tb_max) // 8) * 8)
    else:
        TB = B
    Bp = pl.cdiv(B, TB) * TB
    if Bp != B:
        x = jnp.pad(x, ((0, Bp - B), (0, 0)))

    y = pl.pallas_call(
        _linear_kernel,
        out_shape=jax.ShapeDtypeStruct((Bp, OUT), x.dtype),
        grid=(Bp // TB,),
        in_specs=[
            pl.BlockSpec((TB, IN), lambda i: (i, 0)),   # x streams over batch
            pl.BlockSpec((IN, OUT), lambda i: (0, 0)),  # W.T resident in VMEM
            pl.BlockSpec((1, OUT), lambda i: (0, 0)),   # bias resident in VMEM
        ],
        out_specs=pl.BlockSpec((TB, OUT), lambda i: (i, 0)),
        compiler_params=pltpu.CompilerParams(
            # Batch axis is independent -> shard across TensorCores (v7x: 2 TCs).
            dimension_semantics=("parallel",),
        ),
    )(x, w_t, b2d)

    return y[:B] if Bp != B else y


if __name__ == "__main__":
    key = jax.random.PRNGKey(0)
    kx, kw, kb = jax.random.split(key, 3)

    batch, in_features, out_features = 8, 4, 4

    # Deterministic parameters (shapes from nn.Linear(4, 4)).
    x = jax.random.normal(kx, (batch, in_features), dtype=jnp.float32)
    w = jax.random.normal(kw, (out_features, in_features), dtype=jnp.float32) * 0.5
    b = jax.random.normal(kb, (out_features,), dtype=jnp.float32) * 0.1

    y = linear_pallas(x, w, b)
    jax.block_until_ready(y)

    # Cross-check against plain JAX reference.
    y_ref = x @ w.T + b
    assert jnp.allclose(y, y_ref, atol=1e-5, rtol=1e-5), "mismatch vs reference"

    print("KERNEL_OK")
</pallas_src>

<mosaic_0001>
module attributes {stable_mosaic.version = 11 : i64} {
  func.func @_linear_kernel(%arg0: i32, %arg1: memref<8x4xf32, #tpu.memory_space<vmem>>, %arg2: memref<4x4xf32, #tpu.memory_space<vmem>>, %arg3: memref<1x4xf32, #tpu.memory_space<vmem>>, %arg4: memref<8x4xf32, #tpu.memory_space<vmem>>) attributes {dimension_semantics = [#tpu.dimension_semantics<parallel>], iteration_bounds = array<i64: 1>, scalar_prefetch = 0 : i64, scratch_operands = 0 : i64, tpu.core_type = #tpu.core_type<tc>, window_params = [{transform_indices = @transform_0, window_bounds = array<i64: 8, 4>}, {pipeline_mode = #tpu.pipeline_mode<synchronous>, transform_indices = @transform_1, window_bounds = array<i64: 4, 4>}, {pipeline_mode = #tpu.pipeline_mode<synchronous>, transform_indices = @transform_2, window_bounds = array<i64: 1, 4>}, {transform_indices = @transform_3, window_bounds = array<i64: 8, 4>}]} {
    %c0 = arith.constant 0 : index
    %c0_0 = arith.constant 0 : index
    %0 = vector.load %arg1[%c0, %c0_0] : memref<8x4xf32, #tpu.memory_space<vmem>>, vector<8x4xf32>
    %c0_1 = arith.constant 0 : index
    %c0_2 = arith.constant 0 : index
    %1 = vector.load %arg2[%c0_1, %c0_2] : memref<4x4xf32, #tpu.memory_space<vmem>>, vector<4x4xf32>
    %c0_3 = arith.constant 0 : index
    %c0_4 = arith.constant 0 : index
    %2 = vector.load %arg3[%c0_3, %c0_4] : memref<1x4xf32, #tpu.memory_space<vmem>>, vector<1x4xf32>
    %3 = vector.shape_cast %2 : vector<1x4xf32> to vector<1x4xf32>
    %4 = vector.broadcast %3 : vector<1x4xf32> to vector<8x4xf32>
    %5 = vector.extract_strided_slice %0 {offsets = [0, 0], sizes = [8, 1], strides = [1, 1]} : vector<8x4xf32> to vector<8x1xf32>
    %6 = vector.extract_strided_slice %1 {offsets = [0, 0], sizes = [1, 4], strides = [1, 1]} : vector<4x4xf32> to vector<1x4xf32>
    %7 = vector.broadcast %5 : vector<8x1xf32> to vector<8x4xf32>
    %8 = vector.broadcast %6 : vector<1x4xf32> to vector<8x4xf32>
    %9 = arith.mulf %7, %8 : vector<8x4xf32>
    %10 = arith.addf %4, %9 : vector<8x4xf32>
    %11 = vector.extract_strided_slice %0 {offsets = [0, 1], sizes = [8, 1], strides = [1, 1]} : vector<8x4xf32> to vector<8x1xf32>
    %12 = vector.extract_strided_slice %1 {offsets = [1, 0], sizes = [1, 4], strides = [1, 1]} : vector<4x4xf32> to vector<1x4xf32>
    %13 = vector.broadcast %11 : vector<8x1xf32> to vector<8x4xf32>
    %14 = vector.broadcast %12 : vector<1x4xf32> to vector<8x4xf32>
    %15 = arith.mulf %13, %14 : vector<8x4xf32>
    %16 = arith.addf %10, %15 : vector<8x4xf32>
    %17 = vector.extract_strided_slice %0 {offsets = [0, 2], sizes = [8, 1], strides = [1, 1]} : vector<8x4xf32> to vector<8x1xf32>
    %18 = vector.extract_strided_slice %1 {offsets = [2, 0], sizes = [1, 4], strides = [1, 1]} : vector<4x4xf32> to vector<1x4xf32>
    %19 = vector.broadcast %17 : vector<8x1xf32> to vector<8x4xf32>
    %20 = vector.broadcast %18 : vector<1x4xf32> to vector<8x4xf32>
    %21 = arith.mulf %19, %20 : vector<8x4xf32>
    %22 = arith.addf %16, %21 : vector<8x4xf32>
    %23 = vector.extract_strided_slice %0 {offsets = [0, 3], sizes = [8, 1], strides = [1, 1]} : vector<8x4xf32> to vector<8x1xf32>
    %24 = vector.extract_strided_slice %1 {offsets = [3, 0], sizes = [1, 4], strides = [1, 1]} : vector<4x4xf32> to vector<1x4xf32>
    %25 = vector.broadcast %23 : vector<8x1xf32> to vector<8x4xf32>
    %26 = vector.broadcast %24 : vector<1x4xf32> to vector<8x4xf32>
    %27 = arith.mulf %25, %26 : vector<8x4xf32>
    %28 = arith.addf %22, %27 : vector<8x4xf32>
    %c0_5 = arith.constant 0 : index
    %c0_6 = arith.constant 0 : index
    %29 = vector.load %arg4[%c0_5, %c0_6] : memref<8x4xf32, #tpu.memory_space<vmem>>, vector<8x4xf32>
    tpu.vector_store %arg4[%c0_5, %c0_6], %28 {strides = array<i32>} : memref<8x4xf32, #tpu.memory_space<vmem>>, vector<8x4xf32>,
    return
  }
  func.func @transform_0(%arg0: i32) -> (i32, i32) {
    %c0_i32 = arith.constant 0 : i32
    %c0_i32_0 = arith.constant 0 : i32
    return %arg0, %c0_i32 : i32, i32
  }
  func.func @transform_1(%arg0: i32) -> (i32, i32) {
    %c0_i32 = arith.constant 0 : i32
    %c0_i32_0 = arith.constant 0 : i32
    %c0_i32_1 = arith.constant 0 : i32
    return %c0_i32, %c0_i32_0 : i32, i32
  }
  func.func @transform_2(%arg0: i32) -> (i32, i32) {
    %c0_i32 = arith.constant 0 : i32
    %c0_i32_0 = arith.constant 0 : i32
    %c0_i32_1 = arith.constant 0 : i32
    return %c0_i32, %c0_i32_0 : i32, i32
  }
  func.func @transform_3(%arg0: i32) -> (i32, i32) {
    %c0_i32 = arith.constant 0 : i32
    %c0_i32_0 = arith.constant 0 : i32
    return %arg0, %c0_i32 : i32, i32
  }
}

</mosaic_0001>

<bundles_post_ra>
// kernel: tpu_custom_call.1
= control target key start
LH: loop header
LB: loop body
LE: loop exit
PB: predicated region body
PF: predicated region fallthrough
CT: control target
= control target key end

     0   :  { %v80_v0 = vmov 0   ;;  %v81_v2 = vmov 2   ;;  %v82_v3 = vmov 1   ;;  %v83_v4 = vmov 3   ;;  %s116_s0 = inlined_call_operand.vmem [shape: f32[8,4], index: 0, kind: input, shape index: {}]   ;;  %s117_s1 = inlined_call_operand.vmem [shape: f32[4,4], index: 1, kind: input, shape index: {}]   ;;  %s118_s2 = inlined_call_operand.vmem [shape: f32[1,4], index: 2, kind: input, shape index: {}]   ;;  %s119_s3 = inlined_call_operand.vmem [shape: f32[8,4], index: 3, kind: output, shape index: {}]  }
   0x1   :  { %75 = vset.pattern.permute.xlu0 %v80_v0  ;;  %v14_v1 = vld [vmem:[%s116_s0] sm:$0xff]  ;;  %77 = vset.pattern.permute.xlu1 %v81_v2  ;;  %v28_v5 = vlaneseq  ;;  %vm64_vm0 = vcmask 31744  }
   0x2   :  { %25 = vperm.xlu0 %75, %v14_v1   ;;  %45 = vperm.xlu1 %77, %v14_v1   ;;  %v15_v8 = vld [vmem:[%s117_s1] sm:$0xf] }
   0x3   :  { %v29_v6 = vshrl.u32 %v28_v5, 7  ;;  %v70_v17 = vld [vmem:[%s118_s2] ss:$0 sm:$0xff] }
   0x5   :  { %v30_v7 = vsub.s32 0, %v29_v6  ;;  %v40_v10 = vsub.s32 1, %v29_v6  ;;  %v50_v12 = vsub.s32 2, %v29_v6  ;;  %v60_v14 = vsub.s32 3, %v29_v6 }
   0x6   :  { %76 = vset.pattern.permute.xlu0 %v82_v3  ;;  %78 = vset.pattern.permute.xlu1 %v83_v4 }
   0x7   :  { %35 = vperm.xlu0 %76, %v14_v1   ;;  %55 = vperm.xlu1 %78, %v14_v1   ;;  %v31_v9 = vrot.slane %v15_v8, %v30_v7  ;;  %v41_v16 = vrot.slane %v15_v8, %v40_v10  ;;  %v51_v18 = vrot.slane %v15_v8, %v50_v12 }
   0x8   :  { %v61_v19 = vrot.slane %v15_v8, %v60_v14 }
   0xb   :  { %79 = vset.pattern.permute.xlu0 %v83_v4 }
  0x81   :  { %v26_v11 = vpop.permute.xlu0 %25  ;;  %v46_v13 = vpop.permute.xlu1 %45 }
  0x82   :  { %v32_v15 = vmul.f32 %v31_v9, %v26_v11  ;;  %v52_v24 = vmul.f32 %v51_v18, %v46_v13 }
  0x84   :  { %v33_v22 = vadd.f32 %v70_v17, %v32_v15 }
  0x86   :  { %v36_v20 = vpop.permute.xlu0 %35  ;;  %v56_v21 = vpop.permute.xlu1 %55 }
  0x87   :  { %v42_v23 = vmul.f32 %v41_v16, %v36_v20  ;;  %v62_v26 = vmul.f32 %v61_v19, %v56_v21 }
  0x89   :  { %v43_v25 = vadd.f32 %v42_v23, %v33_v22 }
  0x8b   :  { %v53_v27 = vadd.f32 %v52_v24, %v43_v25 }
  0x8d   :  { %v63_v28 = vadd.f32 %v62_v26, %v53_v27 }
  0x8f   :  { %65 = vst.msk [vmem:[%s119_s3] sm:$0xff] %vm64_vm0, %v63_v28 }

</bundles_post_ra>
